<compile_context>
chip_gen: v6e
topology: v6e:2x2x1
jax: 0.10.0
libtpu: 0.0.40
codegen_flags: <defaults>
</compile_context>

<pallas_src>
from typing import NamedTuple

import jax
import jax.numpy as jnp
import numpy as np
from jax.experimental import pallas as pl
from jax.experimental.pallas import tpu as pltpu


def _round_up(n, m):
    return ((n + m - 1) // m) * m


def _choose_tile(dim, unit, pref):
    """Tile = multiple of `unit`, <= max(pref, unit) and <= round_up(dim, unit),
    minimizing padding of `dim` (largest tile wins ties).  Returns (tile, padded_dim)."""
    dim = int(dim)
    dim_r = _round_up(max(dim, 1), unit)
    cap = min(max(_round_up(int(pref), unit), unit), dim_r)
    best_t, best_pad = None, None
    for t in range(unit, cap + 1, unit):
        pad = _round_up(dim, t) - dim
        if best_pad is None or pad < best_pad or (pad == best_pad and t > best_t):
            best_t, best_pad = t, pad
    return best_t, _round_up(dim, best_t)


class Plan(NamedTuple):
    B: int
    F: int            # input_size
    O: int            # output_size
    horizon: int
    D: int            # horizon * F  (packed reduction dim)
    N: int            # horizon * O  (packed output dim)
    tm: int
    tn: int
    tk: int
    Mp: int
    Np: int
    Kp: int
    in_dtype: object
    vmem_limit_bytes: int   # 0 => leave the compiler default


def make_plan(batch, input_size, output_size, horizon, *,
              in_dtype=jnp.bfloat16, tm_pref=256, tn_pref=1024, tk_pref=1024):
    """Choose padded shapes / tiles once per (batch, model) configuration."""
    D = horizon * input_size
    N = horizon * output_size
    in_dtype = jnp.dtype(in_dtype)
    # Sublane packing: bf16 packs 2 rows/sublane -> M tiles in multiples of 16.
    m_unit = 16 if in_dtype.itemsize == 2 else 8
    tm, Mp = _choose_tile(batch, m_unit, tm_pref)
    tk, Kp = _choose_tile(D, 128, tk_pref)
    tn, Np = _choose_tile(N, 128, tn_pref)

    # v7x megacore: ensure >=2 (i, j) blocks so the two TensorCores can split work
    # along the "parallel" axes (neutral on single-TC v5e/v6e).
    while (Mp // tm) * (Np // tn) < 2 and tn > 128:
        tn, Np = _choose_tile(N, 128, tn // 2)

    # Double-buffered x / W / bias tiles + double-buffered f32 output tile.
    itm = in_dtype.itemsize
    vmem = 2 * (tm * tk * itm + tk * tn * itm + tn * 4) + 2 * (tm * tn * 4)
    # Only raise the scoped-VMEM limit when the default (16 MiB on v5e) is too small;
    # cap at 64 MiB so the request stays within v7x's physical VMEM.
    vmem_limit = 0
    if vmem > 14 * 1024 * 1024:
        vmem_limit = min(int(vmem * 2), 64 * 1024 * 1024)

    return Plan(int(batch), int(input_size), int(output_size), int(horizon), D, N,
                tm, tn, tk, Mp, Np, Kp, in_dtype, vmem_limit)


def init_params(key, input_size, output_size, horizon):
    """torch.nn.Linear-style uniform init for every head, packed (unpadded, f32) into
    the single-matmul layout: W_all[H*F, H*O] (block lower-triangular), b_all[1, H*O]."""
    D = horizon * input_size
    N = horizon * output_size
    w_all = np.zeros((D, N), dtype=np.float32)
    b_all = np.zeros((1, N), dtype=np.float32)
    for t in range(horizon):
        fan_in = (t + 1) * input_size
        bound = 1.0 / np.sqrt(fan_in)
        key, kw, kb = jax.random.split(key, 3)
        wt = jax.random.uniform(kw, (output_size, fan_in),
                                minval=-bound, maxval=bound, dtype=jnp.float32)
        bt = jax.random.uniform(kb, (output_size,),
                                minval=-bound, maxval=bound, dtype=jnp.float32)
        w_all[:fan_in, t * output_size:(t + 1) * output_size] = np.asarray(wt).T
        b_all[0, t * output_size:(t + 1) * output_size] = np.asarray(bt)
    return jnp.asarray(w_all), jnp.asarray(b_all)


def prepare_weights(w_all, b_all, plan: Plan):
    """One-time (per plan) pad + cast of the packed weights, plus the per-N-tile
    K-extent table used to skip structurally-zero weight tiles.  Do NOT call per step."""
    assert w_all.shape == (plan.D, plan.N), w_all.shape
    assert b_all.shape == (1, plan.N), b_all.shape
    w_p = jnp.pad(w_all, ((0, plan.Kp - plan.D), (0, plan.Np - plan.N))
                  ).astype(plan.in_dtype)
    b_p = jnp.pad(b_all, ((0, 0), (0, plan.Np - plan.N))).astype(jnp.float32)

    n_ntiles = plan.Np // plan.tn
    kmax = np.ones((n_ntiles,), dtype=np.int32)
    for j in range(n_ntiles):
        lo, hi = j * plan.tn, min((j + 1) * plan.tn, plan.N)
        if hi > lo:
            t_max = (hi - 1) // plan.O          # last head landing in column block j
            fan_in = (t_max + 1) * plan.F       # populated rows for that head
            kmax[j] = max(1, -(-fan_in // plan.tk))
    assert int(kmax.max()) <= plan.Kp // plan.tk
    return w_p, b_p, jnp.asarray(kmax)


def _matmul_bias_kernel(kmax_ref, x_ref, w_ref, b_ref, o_ref):
    # x_ref: (tm, tk) in_dtype; w_ref: (tk, tn) in_dtype; b_ref: (1, tn) f32;
    # o_ref: (tm, tn) f32 -- block index is constant over the K grid axis, so it is
    # VMEM-resident across k and doubles as the accumulator (no scratch needed).
    j = pl.program_id(1)
    k = pl.program_id(2)

    @pl.when(k == 0)
    def _init():
        # Initialize the resident output tile with the broadcast bias.
        o_ref[...] = jnp.zeros_like(o_ref) + b_ref[...]

    # Skip K tiles that are structurally zero for this output-column block.
    @pl.when(k < kmax_ref[j])
    def _accumulate():
        o_ref[...] += jnp.dot(x_ref[...], w_ref[...],
                              preferred_element_type=jnp.float32)


def linear_regression_forward(x, w_p, b_p, kmax, plan: Plan):
    """x: [B, T, F] (T >= horizon) -> [B, horizon, O] float32."""
    B, T, F = x.shape
    assert B == plan.B and F == plan.F, (x.shape, plan)
    assert T >= plan.horizon, f"need T >= horizon, got T={T}, horizon={plan.horizon}"
    assert w_p.shape == (plan.Kp, plan.Np) and w_p.dtype == plan.in_dtype
    assert b_p.shape == (1, plan.Np)
    assert kmax.shape == (plan.Np // plan.tn,)

    x_flat = x[:, :plan.horizon].reshape(B, plan.D).astype(plan.in_dtype)
    x_flat = jnp.pad(x_flat, ((0, plan.Mp - B), (0, plan.Kp - plan.D)))

    grid = (plan.Mp // plan.tm, plan.Np // plan.tn, plan.Kp // plan.tk)

    def x_map(i, j, k, km):
        # Clamp so skipped K tiles reuse the previous block (Pallas dedups the DMA).
        return (i, jnp.minimum(k, km[j] - 1))

    def w_map(i, j, k, km):
        return (jnp.minimum(k, km[j] - 1), j)

    compiler_kwargs = dict(
        # K is the reduction: it must stay innermost and "arbitrary" (o_ref is
        # initialized at k==0 and accumulated in place across k).
        dimension_semantics=("parallel", "parallel", "arbitrary"))
    if plan.vmem_limit_bytes:
        compiler_kwargs["vmem_limit_bytes"] = plan.vmem_limit_bytes

    out_p = pl.pallas_call(
        _matmul_bias_kernel,
        out_shape=jax.ShapeDtypeStruct((plan.Mp, plan.Np), jnp.float32),
        grid_spec=pltpu.PrefetchScalarGridSpec(
            num_scalar_prefetch=1,
            grid=grid,
            in_specs=[
                pl.BlockSpec((plan.tm, plan.tk), x_map),                  # x tile
                pl.BlockSpec((plan.tk, plan.tn), w_map),                  # W tile
                pl.BlockSpec((1, plan.tn), lambda i, j, k, km: (0, j)),   # bias tile
            ],
            out_specs=pl.BlockSpec((plan.tm, plan.tn),
                                   lambda i, j, k, km: (i, j)),
        ),
        compiler_params=pltpu.CompilerParams(**compiler_kwargs),
    )(kmax, x_flat, w_p, b_p)

    # TODO(synk): for small-batch decode, sweep pipeline_mode=pl.Buffered(3) on the W
    # BlockSpec and (v7x) fp8 / (v5e,v6e) int8 weight storage with in-kernel dequant.
    return out_p[:B, :plan.N].reshape(B, plan.horizon, plan.O)


def reference_forward(x, w_all, b_all, horizon):
    """Pure-JAX reference replicating the PyTorch loop exactly."""
    B, T, F = x.shape
    D, N = w_all.shape
    O = N // horizon
    ys = []
    for t in range(horizon):
        fan_in = (t + 1) * F
        xt = x[:, :t + 1].reshape(B, fan_in)
        wt = w_all[:fan_in, t * O:(t + 1) * O]
        bt = b_all[0, t * O:(t + 1) * O]
        ys.append(xt @ wt + bt)
    return jnp.stack(ys, axis=1)


if __name__ == "__main__":
    B, T = 2, 8
    input_size, output_size, horizon = 3, 2, 4

    key = jax.random.PRNGKey(0)
    kx, kp = jax.random.split(key)
    x = jax.random.normal(kx, (B, T, input_size), dtype=jnp.float32)
    w_all, b_all = init_params(kp, input_size, output_size, horizon)

    ref = jax.block_until_ready(reference_forward(x, w_all, b_all, horizon))

    # --- f32 path: exact PyTorch-equivalent semantics -------------------------------
    plan32 = make_plan(B, input_size, output_size, horizon, in_dtype=jnp.float32)
    w32, b32, km32 = prepare_weights(w_all, b_all, plan32)
    out32 = jax.block_until_ready(linear_regression_forward(x, w32, b32, km32, plan32))
    assert out32.shape == (B, horizon, output_size), out32.shape
    np.testing.assert_allclose(np.asarray(out32), np.asarray(ref),
                               rtol=1e-5, atol=1e-5)

    # --- bf16 path (default; f32 accumulation) ---------------------------------------
    plan16 = make_plan(B, input_size, output_size, horizon, in_dtype=jnp.bfloat16)
    w16, b16, km16 = prepare_weights(w_all, b_all, plan16)
    out16 = jax.block_until_ready(linear_regression_forward(x, w16, b16, km16, plan16))
    assert out16.shape == (B, horizon, output_size), out16.shape
    # Compare against a bf16-consistent reference (same input rounding, f32 math) ...
    ref16 = reference_forward(x.astype(jnp.bfloat16).astype(jnp.float32),
                              np.asarray(w_all).astype(jnp.bfloat16).astype(jnp.float32),
                              b_all, horizon)
    np.testing.assert_allclose(np.asarray(out16), np.asarray(ref16),
                               rtol=1e-4, atol=1e-4)
    # ... and loosely against the full-precision reference (bf16 input rounding).
    np.testing.assert_allclose(np.asarray(out16), np.asarray(ref),
                               rtol=5e-2, atol=5e-2)

    print("KERNEL_OK")
</pallas_src>

<mosaic_0001>
module attributes {stable_mosaic.version = 11 : i64} {
  func.func @_matmul_bias_kernel(%arg0: i32, %arg1: i32, %arg2: i32, %arg3: memref<1xi32, #tpu.memory_space<smem>>, %arg4: memref<8x128xf32, #tpu.memory_space<vmem>>, %arg5: memref<128x128xf32, #tpu.memory_space<vmem>>, %arg6: memref<1x128xf32, #tpu.memory_space<vmem>>, %arg7: memref<8x128xf32, #tpu.memory_space<vmem>>) attributes {dimension_semantics = [#tpu.dimension_semantics<parallel>, #tpu.dimension_semantics<parallel>, #tpu.dimension_semantics<arbitrary>], iteration_bounds = array<i64: 1, 1, 1>, scalar_prefetch = 1 : i64, scratch_operands = 0 : i64, tpu.core_type = #tpu.core_type<tc>, window_params = [{transform_indices = @transform_0, window_bounds = array<i64: 8, 128>}, {transform_indices = @transform_1, window_bounds = array<i64: 128, 128>}, {transform_indices = @transform_2, window_bounds = array<i64: 1, 128>}, {transform_indices = @transform_3, window_bounds = array<i64: 8, 128>}]} {
    %c0_i32 = arith.constant 0 : i32
    %0 = arith.cmpi eq, %arg2, %c0_i32 : i32
    %1 = arith.extui %0 : i1 to i32
    %c0_i32_0 = arith.constant 0 : i32
    %2 = arith.cmpi ne, %1, %c0_i32_0 : i32
    scf.if %2 {
      %cst = arith.constant 0.000000e+00 : f32
      %8 = vector.broadcast %cst : f32 to vector<8x128xf32>
      %c0 = arith.constant 0 : index
      %c0_2 = arith.constant 0 : index
      %9 = vector.load %arg6[%c0, %c0_2] : memref<1x128xf32, #tpu.memory_space<vmem>>, vector<1x128xf32>
      %10 = vector.broadcast %9 : vector<1x128xf32> to vector<8x128xf32>
      %11 = arith.addf %8, %10 : vector<8x128xf32>
      %c0_3 = arith.constant 0 : index
      %c0_4 = arith.constant 0 : index
      %12 = vector.load %arg7[%c0_3, %c0_4] : memref<8x128xf32, #tpu.memory_space<vmem>>, vector<8x128xf32>
      tpu.vector_store %arg7[%c0_3, %c0_4], %11 {strides = array<i32>} : memref<8x128xf32, #tpu.memory_space<vmem>>, vector<8x128xf32>,
    } else {
    }
    %3 = arith.index_cast %arg1 : i32 to index
    %4 = memref.load %arg3[%3] : memref<1xi32, #tpu.memory_space<smem>>
    %5 = arith.cmpi slt, %arg2, %4 : i32
    %6 = arith.extui %5 : i1 to i32
    %c0_i32_1 = arith.constant 0 : i32
    %7 = arith.cmpi ne, %6, %c0_i32_1 : i32
    scf.if %7 {
      %c0 = arith.constant 0 : index
      %c0_2 = arith.constant 0 : index
      %8 = vector.load %arg7[%c0, %c0_2] : memref<8x128xf32, #tpu.memory_space<vmem>>, vector<8x128xf32>
      %c0_3 = arith.constant 0 : index
      %c0_4 = arith.constant 0 : index
      %9 = vector.load %arg4[%c0_3, %c0_4] : memref<8x128xf32, #tpu.memory_space<vmem>>, vector<8x128xf32>
      %c0_5 = arith.constant 0 : index
      %c0_6 = arith.constant 0 : index
      %10 = vector.load %arg5[%c0_5, %c0_6] : memref<128x128xf32, #tpu.memory_space<vmem>>, vector<128x128xf32>
      %cst = arith.constant dense<0.000000e+00> : vector<8x128xf32>
      %11 = tpu.matmul %9, %10, %cst {dimension_numbers = #tpu.dot_dimension_numbers<[1], [0], [0], [1], [0, 0, 1, 1], [], []>} : vector<8x128xf32>, vector<128x128xf32>, vector<8x128xf32> -> vector<8x128xf32>
      %12 = arith.addf %8, %11 : vector<8x128xf32>
      %c0_7 = arith.constant 0 : index
      %c0_8 = arith.constant 0 : index
      %13 = vector.load %arg7[%c0_7, %c0_8] : memref<8x128xf32, #tpu.memory_space<vmem>>, vector<8x128xf32>
      tpu.vector_store %arg7[%c0_7, %c0_8], %12 {strides = array<i32>} : memref<8x128xf32, #tpu.memory_space<vmem>>, vector<8x128xf32>,
    } else {
    }
    return
  }
  func.func @transform_0(%arg0: i32, %arg1: i32, %arg2: i32, %arg3: memref<1xi32, #tpu.memory_space<smem>>) -> (i32, i32) {
    %0 = arith.index_cast %arg1 : i32 to index
    %1 = memref.load %arg3[%0] : memref<1xi32, #tpu.memory_space<smem>>
    %c1_i32 = arith.constant 1 : i32
    %2 = arith.subi %1, %c1_i32 : i32
    %3 = arith.minsi %arg2, %2 : i32
    %c0_i32 = arith.constant 0 : i32
    return %arg0, %3 : i32, i32
  }
  func.func @transform_1(%arg0: i32, %arg1: i32, %arg2: i32, %arg3: memref<1xi32, #tpu.memory_space<smem>>) -> (i32, i32) {
    %0 = arith.index_cast %arg1 : i32 to index
    %1 = memref.load %arg3[%0] : memref<1xi32, #tpu.memory_space<smem>>
    %c1_i32 = arith.constant 1 : i32
    %2 = arith.subi %1, %c1_i32 : i32
    %3 = arith.minsi %arg2, %2 : i32
    %c0_i32 = arith.constant 0 : i32
    return %3, %arg1 : i32, i32
  }
  func.func @transform_2(%arg0: i32, %arg1: i32, %arg2: i32, %arg3: memref<1xi32, #tpu.memory_space<smem>>) -> (i32, i32) {
    %c0_i32 = arith.constant 0 : i32
    %c0_i32_0 = arith.constant 0 : i32
    return %c0_i32, %arg1 : i32, i32
  }
  func.func @transform_3(%arg0: i32, %arg1: i32, %arg2: i32, %arg3: memref<1xi32, #tpu.memory_space<smem>>) -> (i32, i32) {
    %c0_i32 = arith.constant 0 : i32
    return %arg0, %arg1 : i32, i32
  }
}

</mosaic_0001>

<bundles_post_ra>
// kernel: tpu_custom_call.1
= control target key start
LH: loop header
LB: loop body
LE: loop exit
PB: predicated region body
PF: predicated region fallthrough
CT: control target
= control target key end

     0   :  { %10 = vsyncpa [#allocation5], 0  ;;  %s401_s0 = inlined_call_operand.<no memory space> [shape: s32[1], index: 0, kind: input, shape index: {}]   ;;  %s402_s1 = inlined_call_operand.hbm [shape: f32[8,128], index: 1, kind: input, shape index: {}]   ;;  %s403_s2 = inlined_call_operand.hbm [shape: f32[128,128], index: 2, kind: input, shape index: {}]   ;;  %s404_s3 = inlined_call_operand.vmem [shape: f32[1,128], index: 3, kind: input, shape index: {}]   ;;  %s405_s4 = inlined_call_operand.hbm [shape: f32[8,128], index: 4, kind: output, shape index: {}]  }
   0x1   :  { %11 = vsyncpa [#allocation8], 0 }
   0x2   :  { %12 = vsyncpa [#allocation6], 0  ;;  %s193_s17 = sadd.s32 4294967295, %s401_s0  ;;  %s333_s18 = smov [#allocation4]  }
   0x3   :  { %p194_p0 = scmp.gt.s32.totalorder %s193_s17, 0  ;;  %s25_s19 = sshll.u32 %s333_s18, 4  ;;  %s26_s19 = int_to_ptr.vmem [resolvable:$true] %s25_s19 }
   0x4   :  { %s334_s20 = smov [#allocation7]   ;;  %s265_s7 = scalar_lea.hbm %s402_s1, 128 }
   0x5   :  { %s407_s17 = smov (%p194_p0, %s193_s17), 0  ;;  %s41_s21 = sshll.u32 %s334_s20, 4  ;;  %s42_s21 = int_to_ptr.vmem [resolvable:$true] %s41_s21 }
   0x6   :  { %s195_s22 = sshll.u32 %s407_s17, 7  ;;  %s203_s23 = sshll.u32 %s407_s17, 11 }
   0x7   :  { %s23_s26 = scalar_lea.hbm %s402_s1, %s195_s22  ;;  %s374_s29 = scalar_lea.hbm %s403_s2, %s203_s23 }
   0x8   :  { %s263_s30 = scalar_lea.hbm %s23_s26, 128  ;;  %p266_p2 = scmp.lt.s32.totalorder %s23_s26, %s402_s1 }
   0x9   :  { %p264_p1 = scmp.ne.s32.totalorder %s23_s26, %s263_s30  ;;  %p267_p3 = scmp.lt.s32.totalorder %s265_s7, %s263_s30 }
   0xb   :  { %p268_p4 = por %p267_p3, %p266_p2 }
   0xd   :  { %p269_p5 = pnand %p268_p4, %p264_p1 }
   0xf   :  { %272 = shalt.err (!%p269_p5)
}
  0x10   :  { %s273_s10 = scalar_lea.vmem %s26_s19, 128  ;;  %p278_p7 = scmp.lt.s32.totalorder %s26_s19, %s26_s19 }
  0x11   :  { %p274_p6 = scmp.ne.s32.totalorder %s26_s19, %s273_s10  ;;  %p279_p8 = scmp.lt.s32.totalorder %s273_s10, %s273_s10 }
  0x13   :  { %p280_p9 = por %p279_p8, %p278_p7 }
  0x15   :  { %p281_p10 = pnand %p280_p9, %p274_p6 }
  0x17   :  { %284 = shalt.err (!%p281_p10)
}
  0x18   :  { %28 = dma.hbm_to_vmem [thread:$0]  %s23_s26, 128, %s26_s19, [#allocation5]  }
  0x19   :  { %s285_s11 = scalar_lea.hbm %s374_s29, 2048  ;;  %s287_s13 = scalar_lea.hbm %s403_s2, 2048 }
  0x1a   :  { %p286_p11 = scmp.ne.s32.totalorder %s374_s29, %s285_s11  ;;  %p288_p12 = scmp.lt.s32.totalorder %s374_s29, %s403_s2 }
  0x1b   :  { %p289_p13 = scmp.lt.s32.totalorder %s287_s13, %s285_s11 }
  0x1d   :  { %p290_p0 = por %p289_p13, %p288_p12 }
  0x1f   :  { %p291_p1 = pnand %p290_p0, %p286_p11 }
  0x21   :  { %294 = shalt.err (!%p291_p1)
}
  0x22   :  { %s295_s16 = scalar_lea.vmem %s42_s21, 2048  ;;  %p300_p3 = scmp.lt.s32.totalorder %s42_s21, %s42_s21 }
  0x23   :  { %p296_p2 = scmp.ne.s32.totalorder %s42_s21, %s295_s16  ;;  %p301_p4 = scmp.lt.s32.totalorder %s295_s16, %s295_s16 }
  0x25   :  { %p302_p5 = por %p301_p4, %p300_p3 }
  0x27   :  { %p303_p6 = pnand %p302_p5, %p296_p2 }
  0x29   :  { %306 = shalt.err (!%p303_p6)
}
  0x2a   :  { %s335_s17 = smov 128   ;;  %s336_s18 = smov 8  }
  0x2b   :  { %47 = dma.hbm_to_vmem [thread:$0]  %s374_s29, 2048, %s42_s21, [#allocation8], %s335_s17, %s335_s17, %s336_s18  }
  0x2c   :  { %327 = dma.done.wait [#allocation5], 128  }
  0x2d   :  { %328 = vsyncadd [#allocation5], 4294967168 }
  0x2e   :  { %329 = dma.done.wait [#allocation8], 2048  }
  0x2f   :  { %330 = vsyncadd [#allocation8], 4294965248  ;;  %v200_v0 = vld [vmem:[%s404_s3] ss:$0 sm:$0xff]  ;;  %p202_p7 = scmp.le.s32.totalorder %s401_s0, 0 }
  0x30   :  { %77 = vst [vmem:[#allocation9] sm:$0xff] %v200_v0 }
  0x31   :  { %82 = sbr.rel (%p202_p7) target bundleno = 283 (0x11b), region = 29 }
  0x36   :  { %v100_v1 = vld [vmem:[#allocation7 + $0x78] sm:$0xff]  ;;  %v337_v2 = vmov 0.0   ;;  %v99_v3 = vld [vmem:[#allocation7 + $0x70] sm:$0xff]  ;;  %vm338_vm0 = vmmov 0   ;;  %v98_v4 = vld [vmem:[#allocation7 + $0x68] sm:$0xff] }
  0x37   :  { %221 = vmatprep.subr.mxu0 %v337_v2  ;;  %253 = vmatprep.mubr.msk.f32.mxu0 %vm338_vm0, %v337_v2  ;;  %v97_v5 = vld [vmem:[#allocation7 + $0x60] sm:$0xff]  ;;  %v96_v6 = vld [vmem:[#allocation7 + $0x58] sm:$0xff]  ;;  %v95_v7 = vld [vmem:[#allocation7 + $0x50] sm:$0xff] }
  0x38   :  { %222 = vmatpush3.msra.mxu0 %v100_v1  ;;  %v94_v8 = vld [vmem:[#allocation7 + $0x48] sm:$0xff]  ;;  %v93_v9 = vld [vmem:[#allocation7 + $0x40] sm:$0xff]  ;;  %v92_v10 = vld [vmem:[#allocation7 + $0x38] sm:$0xff] }
  0x39   :  { %223 = vmatprep.subr.mxu0 %v337_v2  ;;  %v91_v11 = vld [vmem:[#allocation7 + $0x30] sm:$0xff]  ;;  %v90_v12 = vld [vmem:[#allocation7 + $0x28] sm:$0xff]  ;;  %v89_v13 = vld [vmem:[#allocation7 + $0x20] sm:$0xff] }
  0x3a   :  { %224 = vmatpush3.msra.mxu0 %v99_v3  ;;  %v88_v14 = vld [vmem:[#allocation7 + $0x18] sm:$0xff]  ;;  %v87_v15 = vld [vmem:[#allocation7 + $0x10] sm:$0xff]  ;;  %v86_v16 = vld [vmem:[#allocation7 + $0x8] sm:$0xff] }
  0x3b   :  { %225 = vmatprep.subr.mxu0 %v337_v2  ;;  %v85_v17 = vld [vmem:[#allocation7] sm:$0xff]  ;;  %v84_v18 = vld [vmem:[#allocation4] sm:$0xff] }
  0x3c   :  { %226 = vmatpush3.msra.mxu0 %v98_v4  ;;  %v83_v19 = vld [vmem:[#allocation9] sm:$0xff] }
  0x3d   :  { %227 = vmatprep.subr.mxu0 %v337_v2 }
  0x3e   :  { %228 = vmatpush3.msra.mxu0 %v97_v5 }
  0x3f   :  { %229 = vmatprep.subr.mxu0 %v337_v2 }
  0x40   :  { %230 = vmatpush3.msra.mxu0 %v96_v6 }
  0x41   :  { %231 = vmatprep.subr.mxu0 %v337_v2 }
  0x42   :  { %232 = vmatpush3.msra.mxu0 %v95_v7 }
  0x43   :  { %233 = vmatprep.subr.mxu0 %v337_v2 }
  0x44   :  { %234 = vmatpush3.msra.mxu0 %v94_v8 }
  0x45   :  { %235 = vmatprep.subr.mxu0 %v337_v2 }
  0x46   :  { %236 = vmatpush3.msra.mxu0 %v93_v9 }
  0x47   :  { %237 = vmatprep.subr.mxu0 %v337_v2 }
  0x48   :  { %238 = vmatpush3.msra.mxu0 %v92_v10 }
  0x49   :  { %239 = vmatprep.subr.mxu0 %v337_v2 }
  0x4a   :  { %240 = vmatpush3.msra.mxu0 %v91_v11 }
  0x4b   :  { %241 = vmatprep.subr.mxu0 %v337_v2 }
  0x4c   :  { %242 = vmatpush3.msra.mxu0 %v90_v12 }
  0x4d   :  { %243 = vmatprep.subr.mxu0 %v337_v2 }
  0x4e   :  { %244 = vmatpush3.msra.mxu0 %v89_v13 }
  0x4f   :  { %245 = vmatprep.subr.mxu0 %v337_v2 }
  0x50   :  { %246 = vmatpush3.msra.mxu0 %v88_v14 }
  0x51   :  { %247 = vmatprep.subr.mxu0 %v337_v2 }
  0x52   :  { %248 = vmatpush3.msra.mxu0 %v87_v15 }
  0x53   :  { %249 = vmatprep.subr.mxu0 %v337_v2 }
  0x54   :  { %250 = vmatpush3.msra.mxu0 %v86_v16 }
  0x55   :  { %251 = vmatprep.subr.mxu0 %v337_v2 }
  0x56   :  { %252 = vmatpush3.msra.mxu0 %v85_v17 }
  0x57   :  { %254 = vmatmul.mubr.f32.vlgmr.msra.gmra.mxu0 %v84_v18 }
 0x117   :  { %v167_v20 = vpop.f32.mrf.mxu0 }
 0x118   :  { %v171_v21 = vadd.f32 %v167_v20, %v83_v19 }
 0x119   :  { %v255_v22 = vpop.f32.mrf.mxu0 }
 0x11a   :  { %172 = vst [vmem:[#allocation9] sm:$0xff] %v171_v21 }
 0x11b PF:  { %s339_s0 = smov [#allocation9]  }
 0x11c   :  { %s179_s3 = sshll.u32 %s339_s0, 4  ;;  %s180_s3 = int_to_ptr.vmem [resolvable:$true] %s179_s3 }
 0x11d   :  { %s307_s21 = scalar_lea.vmem %s180_s3, 128  ;;  %p312_p9 = scmp.lt.s32.totalorder %s180_s3, %s180_s3 }
 0x11e   :  { %p308_p8 = scmp.ne.s32.totalorder %s180_s3, %s307_s21  ;;  %p313_p10 = scmp.lt.s32.totalorder %s307_s21, %s307_s21 }
 0x120   :  { %p314_p11 = por %p313_p10, %p312_p9 }
 0x122   :  { %p315_p12 = pnand %p314_p11, %p308_p8 }
 0x124   :  { %318 = shalt.err (!%p315_p12)
}
 0x125   :  { %182 = dma.vmem_to_hbm [thread:$0]  %s180_s3, 128, %s405_s4, [#allocation6]  }
 0x126   :  { %331 = dma.done.wait [#allocation6], 128  }
 0x127   :  { %332 = vsyncadd [#allocation6], 4294967168 }
 0x128   :  { %186 = vsyncpa [#allocation5], 1 }
 0x129   :  { %187 = vsyncpa [#allocation8], 1 }
 0x12a   :  { %188 = vsyncpa [#allocation6], 1 }

</bundles_post_ra>
